<compile_context>
chip_gen: v7x
topology: tpu7x:2x2x1
jax: 0.10.0
libtpu: 0.0.40
codegen_flags: <defaults>
</compile_context>

<pallas_src>
import functools

import jax
import jax.numpy as jnp
import numpy as np
from jax.experimental import pallas as pl
from jax.experimental.pallas import tpu as pltpu


def _ssr_kernel(p_ref, v_ref, o_ref, *, bins: int, n_angles: int, V: float):
    # p_ref : (3*bins*N, TB)  stacked stage probabilities, batch on lanes.
    #         row = k*bins*N + i*N + n  <->  pred_k[b, n, i]
    # v_ref : (6*N, TB)       [delta1, delta2, delta3, scale1, scale2, scale3]
    # o_ref : (N, TB)         float32 output, batch on lanes.
    N = n_angles
    doffset = bins // 2
    f32 = jnp.float32

    p = p_ref[...].astype(f32)          # (3*bins*N, TB)
    v = v_ref[...].astype(f32)          # (6*N, TB)

    deltas = [v[k * N:(k + 1) * N, :] for k in range(3)]          # (N, TB) each
    scales = [v[(3 + k) * N:(4 + k) * N, :] for k in range(3)]    # (N, TB) each

    # Per-stage soft regression: static, contiguous row slices of the slab.
    stages = []
    for k in range(3):
        acc = jnp.zeros_like(deltas[k])
        for i in range(bins):
            row0 = (k * bins + i) * N
            pi = p[row0:row0 + N, :]                               # (N, TB)
            acc = acc + (float(i - doffset) + deltas[k]) * pi
        stages.append(acc)

    # Exact reciprocals (approx=False keeps 1e-5 agreement with the reference);
    # the shared inv1*inv2 factor is hoisted and reused for both b and c terms.
    fb = float(bins)
    inv1 = pl.reciprocal(fb * (1.0 + scales[0]))
    inv2 = pl.reciprocal(fb * (1.0 + scales[1]))
    inv3 = pl.reciprocal(fb * (1.0 + scales[2]))
    inv12 = inv1 * inv2

    pred = (stages[0] * inv1 + stages[1] * inv12 + stages[2] * (inv12 * inv3)) * V
    o_ref[...] = pred.astype(o_ref.dtype)


def ssr_layer(x, bins: int, V: float = 99.0, tile_b: int = 4096):
    """x = ((pred1, delta1, scale1), (pred2, delta2, scale2), (pred3, delta3, scale3)).

    pred_k: (B, N, bins), delta_k / scale_k: (B, N).  Returns (B, N) float32.
    """
    (p1, d1, c1), (p2, d2, c2), (p3, d3, c3) = x
    B, N, nb = p1.shape
    assert nb == bins

    # --- layout plumbing: 2 stacked slabs, batch on the lane axis ----------
    # preds: (3, B, N, bins) -> (3, bins, N, B) -> (3*bins*N, B)
    preds = jnp.transpose(jnp.stack([p1, p2, p3], axis=0), (0, 3, 2, 1))
    preds = preds.reshape(3 * bins * N, B)
    # deltas/scales: (6, B, N) -> (6, N, B) -> (6*N, B)
    vecs = jnp.transpose(jnp.stack([d1, d2, d3, c1, c2, c3], axis=0), (0, 2, 1))
    vecs = vecs.reshape(6 * N, B)

    # --- batch tiling -------------------------------------------------------
    # Single grid step for typical batches (everything fits trivially in VMEM);
    # only very large batches split into 128-aligned tiles, marked "parallel"
    # so v7x's two TensorCores can share them.
    TB = B if B <= tile_b else tile_b          # tile_b is a multiple of 128
    grid = (pl.cdiv(B, TB),)
    # NOTE: if B > tile_b and B % TB != 0, padded lanes of the last tile feed
    # garbage through 1/(1+scale); writes are masked so visible output is fine.

    p_spec = pl.BlockSpec((3 * bins * N, TB), lambda b: (0, b))
    v_spec = pl.BlockSpec((6 * N, TB), lambda b: (0, b))
    o_spec = pl.BlockSpec((N, TB), lambda b: (0, b))

    kernel = functools.partial(_ssr_kernel, bins=bins, n_angles=N, V=V)
    out_nb = pl.pallas_call(
        kernel,
        out_shape=jax.ShapeDtypeStruct((N, B), jnp.float32),
        grid=grid,
        in_specs=[p_spec, v_spec],
        out_specs=o_spec,
        compiler_params=pltpu.CompilerParams(
            dimension_semantics=("parallel",)),
    )(preds, vecs)

    # Tiny (N=3, B) transpose kept only to preserve the PyTorch (B, N) layout.
    return out_nb.T


def _reference(x, bins: int, V: float = 99.0):
    """Pure-JAX mirror of the PyTorch SSRLayer.forward."""
    s1, s2, s3 = x
    doffset = bins // 2
    a = b = c = 0.0
    for i in range(bins):
        a = a + (i - doffset + s1[1]) * s1[0][:, :, i]
    a = a / (bins * (1 + s1[2]))
    for i in range(bins):
        b = b + (i - doffset + s2[1]) * s2[0][:, :, i]
    b = b / (bins * (1 + s1[2])) / (bins * (1 + s2[2]))
    for i in range(bins):
        c = c + (i - doffset + s3[1]) * s3[0][:, :, i]
    c = c / (bins * (1 + s1[2])) / (bins * (1 + s2[2])) / (bins * (1 + s3[2]))
    return (a + b + c) * V


if __name__ == "__main__":
    # FSA-Net-like shapes: B samples, N=3 angles (yaw/pitch/roll), 3 bins/stage.
    B, N, bins = 2, 3, 3

    key = jax.random.PRNGKey(0)
    keys = jax.random.split(key, 9)

    def mk_stage(kp, kd, ks):
        pred = jax.nn.softmax(
            jax.random.normal(kp, (B, N, bins), dtype=jnp.float32), axis=-1)
        delta = jax.random.uniform(kd, (B, N), jnp.float32, minval=-0.5, maxval=0.5)
        scale = jax.random.uniform(ks, (B, N), jnp.float32, minval=-0.2, maxval=0.2)
        return (pred, delta, scale)

    s1 = mk_stage(*keys[0:3])
    s2 = mk_stage(*keys[3:6])
    s3 = mk_stage(*keys[6:9])
    x = (s1, s2, s3)

    out = jax.block_until_ready(ssr_layer(x, bins=bins))
    ref = jax.block_until_ready(_reference(x, bins=bins))
    np.testing.assert_allclose(np.asarray(out), np.asarray(ref),
                               rtol=1e-5, atol=1e-5)

    print("KERNEL_OK")
</pallas_src>

<mosaic_0001>
module attributes {stable_mosaic.version = 11 : i64} {
  func.func @_ssr_kernel(%arg0: i32, %arg1: memref<27x2xf32, #tpu.memory_space<vmem>>, %arg2: memref<18x2xf32, #tpu.memory_space<vmem>>, %arg3: memref<3x2xf32, #tpu.memory_space<vmem>>) attributes {dimension_semantics = [#tpu.dimension_semantics<parallel>], iteration_bounds = array<i64: 1>, scalar_prefetch = 0 : i64, scratch_operands = 0 : i64, tpu.core_type = #tpu.core_type<tc>, window_params = [{transform_indices = @transform_0, window_bounds = array<i64: 27, 2>}, {transform_indices = @transform_1, window_bounds = array<i64: 18, 2>}, {transform_indices = @transform_2, window_bounds = array<i64: 3, 2>}]} {
    %c0 = arith.constant 0 : index
    %c0_0 = arith.constant 0 : index
    %0 = vector.load %arg1[%c0, %c0_0] : memref<27x2xf32, #tpu.memory_space<vmem>>, vector<27x2xf32>
    %c0_1 = arith.constant 0 : index
    %c0_2 = arith.constant 0 : index
    %1 = vector.load %arg2[%c0_1, %c0_2] : memref<18x2xf32, #tpu.memory_space<vmem>>, vector<18x2xf32>
    %2 = vector.extract_strided_slice %1 {offsets = [0, 0], sizes = [3, 2], strides = [1, 1]} : vector<18x2xf32> to vector<3x2xf32>
    %3 = vector.extract_strided_slice %1 {offsets = [3, 0], sizes = [3, 2], strides = [1, 1]} : vector<18x2xf32> to vector<3x2xf32>
    %4 = vector.extract_strided_slice %1 {offsets = [6, 0], sizes = [3, 2], strides = [1, 1]} : vector<18x2xf32> to vector<3x2xf32>
    %5 = vector.extract_strided_slice %1 {offsets = [9, 0], sizes = [3, 2], strides = [1, 1]} : vector<18x2xf32> to vector<3x2xf32>
    %6 = vector.extract_strided_slice %1 {offsets = [12, 0], sizes = [3, 2], strides = [1, 1]} : vector<18x2xf32> to vector<3x2xf32>
    %7 = vector.extract_strided_slice %1 {offsets = [15, 0], sizes = [3, 2], strides = [1, 1]} : vector<18x2xf32> to vector<3x2xf32>
    %cst = arith.constant 0.000000e+00 : f32
    %8 = vector.broadcast %cst : f32 to vector<3x2xf32>
    %9 = vector.extract_strided_slice %0 {offsets = [0, 0], sizes = [3, 2], strides = [1, 1]} : vector<27x2xf32> to vector<3x2xf32>
    %cst_3 = arith.constant -1.000000e+00 : f32
    %10 = vector.broadcast %cst_3 : f32 to vector<3x2xf32>
    %11 = arith.addf %10, %2 : vector<3x2xf32>
    %12 = arith.mulf %11, %9 : vector<3x2xf32>
    %13 = arith.addf %8, %12 : vector<3x2xf32>
    %14 = vector.extract_strided_slice %0 {offsets = [3, 0], sizes = [3, 2], strides = [1, 1]} : vector<27x2xf32> to vector<3x2xf32>
    %cst_4 = arith.constant 0.000000e+00 : f32
    %15 = vector.broadcast %cst_4 : f32 to vector<3x2xf32>
    %16 = arith.addf %15, %2 : vector<3x2xf32>
    %17 = arith.mulf %16, %14 : vector<3x2xf32>
    %18 = arith.addf %13, %17 : vector<3x2xf32>
    %19 = vector.extract_strided_slice %0 {offsets = [6, 0], sizes = [3, 2], strides = [1, 1]} : vector<27x2xf32> to vector<3x2xf32>
    %cst_5 = arith.constant 1.000000e+00 : f32
    %20 = vector.broadcast %cst_5 : f32 to vector<3x2xf32>
    %21 = arith.addf %20, %2 : vector<3x2xf32>
    %22 = arith.mulf %21, %19 : vector<3x2xf32>
    %23 = arith.addf %18, %22 : vector<3x2xf32>
    %cst_6 = arith.constant 0.000000e+00 : f32
    %24 = vector.broadcast %cst_6 : f32 to vector<3x2xf32>
    %25 = vector.extract_strided_slice %0 {offsets = [9, 0], sizes = [3, 2], strides = [1, 1]} : vector<27x2xf32> to vector<3x2xf32>
    %cst_7 = arith.constant -1.000000e+00 : f32
    %26 = vector.broadcast %cst_7 : f32 to vector<3x2xf32>
    %27 = arith.addf %26, %3 : vector<3x2xf32>
    %28 = arith.mulf %27, %25 : vector<3x2xf32>
    %29 = arith.addf %24, %28 : vector<3x2xf32>
    %30 = vector.extract_strided_slice %0 {offsets = [12, 0], sizes = [3, 2], strides = [1, 1]} : vector<27x2xf32> to vector<3x2xf32>
    %cst_8 = arith.constant 0.000000e+00 : f32
    %31 = vector.broadcast %cst_8 : f32 to vector<3x2xf32>
    %32 = arith.addf %31, %3 : vector<3x2xf32>
    %33 = arith.mulf %32, %30 : vector<3x2xf32>
    %34 = arith.addf %29, %33 : vector<3x2xf32>
    %35 = vector.extract_strided_slice %0 {offsets = [15, 0], sizes = [3, 2], strides = [1, 1]} : vector<27x2xf32> to vector<3x2xf32>
    %cst_9 = arith.constant 1.000000e+00 : f32
    %36 = vector.broadcast %cst_9 : f32 to vector<3x2xf32>
    %37 = arith.addf %36, %3 : vector<3x2xf32>
    %38 = arith.mulf %37, %35 : vector<3x2xf32>
    %39 = arith.addf %34, %38 : vector<3x2xf32>
    %cst_10 = arith.constant 0.000000e+00 : f32
    %40 = vector.broadcast %cst_10 : f32 to vector<3x2xf32>
    %41 = vector.extract_strided_slice %0 {offsets = [18, 0], sizes = [3, 2], strides = [1, 1]} : vector<27x2xf32> to vector<3x2xf32>
    %cst_11 = arith.constant -1.000000e+00 : f32
    %42 = vector.broadcast %cst_11 : f32 to vector<3x2xf32>
    %43 = arith.addf %42, %4 : vector<3x2xf32>
    %44 = arith.mulf %43, %41 : vector<3x2xf32>
    %45 = arith.addf %40, %44 : vector<3x2xf32>
    %46 = vector.extract_strided_slice %0 {offsets = [21, 0], sizes = [3, 2], strides = [1, 1]} : vector<27x2xf32> to vector<3x2xf32>
    %cst_12 = arith.constant 0.000000e+00 : f32
    %47 = vector.broadcast %cst_12 : f32 to vector<3x2xf32>
    %48 = arith.addf %47, %4 : vector<3x2xf32>
    %49 = arith.mulf %48, %46 : vector<3x2xf32>
    %50 = arith.addf %45, %49 : vector<3x2xf32>
    %51 = vector.extract_strided_slice %0 {offsets = [24, 0], sizes = [3, 2], strides = [1, 1]} : vector<27x2xf32> to vector<3x2xf32>
    %cst_13 = arith.constant 1.000000e+00 : f32
    %52 = vector.broadcast %cst_13 : f32 to vector<3x2xf32>
    %53 = arith.addf %52, %4 : vector<3x2xf32>
    %54 = arith.mulf %53, %51 : vector<3x2xf32>
    %55 = arith.addf %50, %54 : vector<3x2xf32>
    %cst_14 = arith.constant 1.000000e+00 : f32
    %56 = vector.broadcast %cst_14 : f32 to vector<3x2xf32>
    %57 = arith.addf %56, %5 : vector<3x2xf32>
    %cst_15 = arith.constant 3.000000e+00 : f32
    %58 = vector.broadcast %cst_15 : f32 to vector<3x2xf32>
    %59 = arith.mulf %58, %57 : vector<3x2xf32>
    %60 = tpu.reciprocal %59 : vector<3x2xf32> -> vector<3x2xf32>
    %cst_16 = arith.constant 1.000000e+00 : f32
    %61 = vector.broadcast %cst_16 : f32 to vector<3x2xf32>
    %62 = arith.addf %61, %6 : vector<3x2xf32>
    %cst_17 = arith.constant 3.000000e+00 : f32
    %63 = vector.broadcast %cst_17 : f32 to vector<3x2xf32>
    %64 = arith.mulf %63, %62 : vector<3x2xf32>
    %65 = tpu.reciprocal %64 : vector<3x2xf32> -> vector<3x2xf32>
    %cst_18 = arith.constant 1.000000e+00 : f32
    %66 = vector.broadcast %cst_18 : f32 to vector<3x2xf32>
    %67 = arith.addf %66, %7 : vector<3x2xf32>
    %cst_19 = arith.constant 3.000000e+00 : f32
    %68 = vector.broadcast %cst_19 : f32 to vector<3x2xf32>
    %69 = arith.mulf %68, %67 : vector<3x2xf32>
    %70 = tpu.reciprocal %69 : vector<3x2xf32> -> vector<3x2xf32>
    %71 = arith.mulf %60, %65 : vector<3x2xf32>
    %72 = arith.mulf %23, %60 : vector<3x2xf32>
    %73 = arith.mulf %39, %71 : vector<3x2xf32>
    %74 = arith.addf %72, %73 : vector<3x2xf32>
    %75 = arith.mulf %71, %70 : vector<3x2xf32>
    %76 = arith.mulf %55, %75 : vector<3x2xf32>
    %77 = arith.addf %74, %76 : vector<3x2xf32>
    %cst_20 = arith.constant 9.900000e+01 : f32
    %78 = vector.broadcast %cst_20 : f32 to vector<3x2xf32>
    %79 = arith.mulf %77, %78 : vector<3x2xf32>
    %c0_21 = arith.constant 0 : index
    %c0_22 = arith.constant 0 : index
    %80 = vector.load %arg3[%c0_21, %c0_22] : memref<3x2xf32, #tpu.memory_space<vmem>>, vector<3x2xf32>
    tpu.vector_store %arg3[%c0_21, %c0_22], %79 {strides = array<i32>} : memref<3x2xf32, #tpu.memory_space<vmem>>, vector<3x2xf32>,
    return
  }
  func.func @transform_0(%arg0: i32) -> (i32, i32) {
    %c0_i32 = arith.constant 0 : i32
    %c0_i32_0 = arith.constant 0 : i32
    return %c0_i32, %arg0 : i32, i32
  }
  func.func @transform_1(%arg0: i32) -> (i32, i32) {
    %c0_i32 = arith.constant 0 : i32
    %c0_i32_0 = arith.constant 0 : i32
    return %c0_i32, %arg0 : i32, i32
  }
  func.func @transform_2(%arg0: i32) -> (i32, i32) {
    %c0_i32 = arith.constant 0 : i32
    %c0_i32_0 = arith.constant 0 : i32
    return %c0_i32, %arg0 : i32, i32
  }
}

</mosaic_0001>

<bundles_post_ra>
// kernel: tpu_custom_call.1
= control target key start
LH: loop header
LB: loop body
LE: loop exit
PB: predicated region body
PF: predicated region fallthrough
CT: control target
= control target key end

     0   :  { %vm29_vm0 = vcmask 1041408   ;;  %vm44_vm1 = vcmask 1043456   ;;  %vm111_vm2 = vcmask 10240   ;;  %s163_s1 = inlined_call_operand.vmem [shape: f32[18,2], index: 1, kind: input, shape index: {}]   ;;  %s164_s0 = inlined_call_operand.vmem [shape: f32[27,2], index: 0, kind: input, shape index: {}]   ;;  %s165_s2 = inlined_call_operand.vmem [shape: f32[3,2], index: 2, kind: output, shape index: {}]  }
   0x1   :  { %v16_v0 = vld [vmem:[%s163_s1 + $0x8] sm:$0xff]  ;;  %v17_v1 = vld [vmem:[%s163_s1 + $0x10] sm:$0x3]  ;;  %v11_v4 = vld [vmem:[%s164_s0] sm:$0xff] }
   0x2   :  { %v64_v2 = vadd.f32 1.0, %v16_v0  ;;  %v74_v3 = vadd.f32 1.0, %v17_v1  ;;  %v12_v5 = vld [vmem:[%s164_s0 + $0x8] sm:$0xff]  ;;  %v15_v6 = vld [vmem:[%s163_s1] sm:$0xff]  ;;  %v13_v9 = vld [vmem:[%s164_s0 + $0x10] sm:$0xff]  ;;  %v23_v10 = vrot.slane %v11_v4, 3 }
   0x3   :  { %v18_v11 = vadd.f32 -1.0, %v15_v6  ;;  %v31_v12 = vrot.slane %v12_v5, 6  ;;  %v39_v13 = vrot.slane %v12_v5, 1  ;;  %v30_v14 = vrot.slane %v11_v4, 6  ;;  %v14_v17 = vld [vmem:[%s164_s0 + $0x18] sm:$0x7] }
   0x4   :  { %v72_v7 = vmul.f32 3.0, %v64_v2  ;;  %v75_v8 = vmul.f32 3.0, %v74_v3  ;;  %v45_v15 = vrot.slane %v12_v5, 4  ;;  %v46_v16 = vrot.slane %v13_v9, 4 }
   0x5   :  { %v51_v18 = vadd.f32 -1.0, %v16_v0  ;;  %v58_v19 = vrot.slane %v13_v9, 7  ;;  %v27_v20 = vadd.f32 1.0, %v15_v6  ;;  %v19_v21 = vmul.f32 %v18_v11, %v11_v4 }
   0x6   :  { %117 = vrcp.f32 %v72_v7  ;;  %v25_v22 = vmul.f32 %v23_v10, %v15_v6  ;;  %v37_v23 = vmul.f32 %v31_v12, %v18_v11  ;;  %v41_v24 = vmul.f32 %v39_v13, %v15_v6 }
   0x7   :  { %119 = vrcp.f32 %v75_v8  ;;  %v32_v25 = vsel %vm29_vm0, %v30_v14, %v31_v12  ;;  %v47_v26 = vsel %vm44_vm1, %v45_v15, %v46_v16  ;;  %v66_v27 = vrot.slane %v14_v17, 2 }
   0x8   :  { %v53_v28 = vmul.f32 %v46_v16, %v18_v11  ;;  %v54_v29 = vmul.f32 %v51_v18, %v46_v16  ;;  %v60_v30 = vmul.f32 %v58_v19, %v15_v6  ;;  %v61_v31 = vmul.f32 %v58_v19, %v16_v0 }
   0x9   :  { %v26_v32 = vadd.f32 %v25_v22, %v19_v21  ;;  %v34_v33 = vmul.f32 %v32_v25, %v27_v20  ;;  %v42_v34 = vadd.f32 %v41_v24, %v37_v23  ;;  %v49_v35 = vmul.f32 %v47_v26, %v27_v20 }
   0xa   :  { %v68_v37 = vmul.f32 %v66_v27, %v27_v20  ;;  %v69_v38 = vmul.f32 %v66_v27, %v64_v2  ;;  %v62_v40 = vadd.f32 %v60_v30, %v53_v28  ;;  %v63_v41 = vadd.f32 %v61_v31, %v54_v29 }
   0xb   :  { %v35_v45 = vadd.f32 %v34_v33, %v26_v32  ;;  %v50_v46 = vadd.f32 %v49_v35, %v42_v34 }
   0xc   :  { %v70_v50 = vadd.f32 %v68_v37, %v62_v40  ;;  %v71_v51 = vadd.f32 %v69_v38, %v63_v41 }
  0x10   :  { %v118_v36 = vpop.eup %117 }
  0x11   :  { %v120_v39 = vpop.eup %119  ;;  %v78_v42 = vrot.slane %v118_v36, 3  ;;  %v93_v43 = vrot.slane %v118_v36, 6  ;;  %v81_v48 = vrot.slane %v118_v36, 1 }
  0x12   :  { %v94_v44 = vrot.slane %v120_v39, 6 }
  0x13   :  { %v80_v47 = vmul.f32 %v118_v36, %v78_v42  ;;  %v83_v54 = vmul.f32 %v81_v48, %v35_v45 }
  0x14   :  { %v95_v49 = vsel %vm29_vm0, %v93_v43, %v94_v44 }
  0x15   :  { %v85_v52 = vrot.slane %v80_v47, 6  ;;  %v97_v53 = vmul.f32 %v95_v49, %v80_v47 }
  0x17   :  { %v87_v55 = vmul.f32 %v85_v52, %v50_v46  ;;  %v99_v56 = vrot.slane %v97_v53, 3 }
  0x19   :  { %v89_v57 = vrot.slane %v87_v55, 3  ;;  %v101_v58 = vmul.f32 %v99_v56, %v70_v50  ;;  %v102_v59 = vmul.f32 %v99_v56, %v71_v51 }
  0x1b   :  { %v91_v60 = vadd.f32 %v89_v57, %v83_v54  ;;  %v105_v61 = vrot.slane %v101_v58, 6  ;;  %v106_v62 = vrot.slane %v102_v59, 6 }
  0x1d   :  { %v107_v63 = vsel %vm29_vm0, %v105_v61, %v106_v62 }
  0x1e   :  { %v109_v0 = vadd.f32 %v107_v63, %v91_v60 }
  0x20   :  { %v110_v1 = vmul.f32 99.0, %v109_v0 }
  0x22   :  { %112 = vst.msk [vmem:[%s165_s2] sm:$0x7] %vm111_vm2, %v110_v1 }

</bundles_post_ra>
